<compile_context>
chip_gen: v5e
topology: v5e:2x2
jax: 0.10.0
libtpu: 0.0.40
codegen_flags: <defaults>
</compile_context>

<pallas_src>
import jax
import jax.numpy as jnp
from jax.experimental import pallas as pl
from jax.experimental.pallas import tpu as pltpu


def _round_up(x, m):
    return ((x + m - 1) // m) * m


def _vmem_capacity_bytes():
    """Physical VMEM of this TPU generation (128 MiB v5e/v6e, 64 MiB/core v7x)."""
    try:
        info = pltpu.get_tpu_info()
        cap = int(getattr(info, "vmem_capacity_bytes", 0) or 0)
        if cap > 0:
            return cap
    except Exception:
        pass
    return 64 * 1024 * 1024  # conservative default (v7x per-core VMEM)


# ---------------------------------------------------------------------------
# Kernels
# ---------------------------------------------------------------------------

def _fused_resident_kernel(x_ref, w1_ref, b1_ref, w2_ref, b2_ref, o_ref):
    """relu(x @ W1 + b1) @ W2 + b2 for one row tile; all weights VMEM-resident."""
    x = x_ref[...].astype(w1_ref.dtype)                 # cast on the VPU (free vs HBM)
    h = jnp.dot(x, w1_ref[...], preferred_element_type=jnp.float32)
    h = jnp.maximum(h + b1_ref[...], 0.0)               # bias + ReLU in f32
    y = jnp.dot(h.astype(w2_ref.dtype), w2_ref[...],
                preferred_element_type=jnp.float32)
    o_ref[...] = (y + b2_ref[...]).astype(o_ref.dtype)


def _fused_tiled_kernel(x_ref, w1_ref, b1_ref, w2_ref, b2_ref, o_ref, h_ref):
    """Fallback for very large d_model: W2 streamed per output-column tile."""
    j = pl.program_id(1)

    # Hidden row-block computed once per row tile, cached and reused for all j.
    @pl.when(j == 0)
    def _():
        x = x_ref[...].astype(w1_ref.dtype)
        h = jnp.dot(x, w1_ref[...], preferred_element_type=jnp.float32)
        h_ref[...] = jnp.maximum(h + b1_ref[...], 0.0).astype(h_ref.dtype)

    y = jnp.dot(h_ref[...], w2_ref[...], preferred_element_type=jnp.float32)
    o_ref[...] = (y + b2_ref[...]).astype(o_ref.dtype)


# ---------------------------------------------------------------------------
# Wrapper
# ---------------------------------------------------------------------------

def make_feature_extractor(w1, b1, w2, b2, *, compute_dtype=None, out_dtype=None,
                           tm=512, tn=512):
    """Build a forward(x) closure for the FeatureExtractor MLP.

    w1: [in_features, d_model]  b1: [d_model]   (LazyLinear, stored as [in, out])
    w2: [d_model, d_model]      b2: [d_model]
    compute_dtype: MXU operand dtype (e.g. jnp.bfloat16); accumulation, bias add
                   and ReLU always stay float32.
    """
    in_features, d_model = w1.shape
    assert w2.shape == (d_model, d_model)
    assert b1.shape == (d_model,) and b2.shape == (d_model,)
    compute_dtype = jnp.dtype(compute_dtype) if compute_dtype is not None else jnp.dtype(w1.dtype)

    # Hidden/output feature dim padded to a lane-dense multiple of 128.  The
    # contraction dim K is never tiled, so it stays un-padded (full-dim blocks
    # are always legal) and x needs no wrapper-side lane padding.
    Dp = _round_up(d_model, 128)
    K = in_features

    # Weights padded + cast ONCE here (not per forward call).  Zero padding
    # keeps the math exact: padded hidden columns are relu(0)=0 and the
    # corresponding padded W2 rows are 0.
    w1p = jnp.pad(w1, ((0, 0), (0, Dp - d_model))).astype(compute_dtype)
    w2p = jnp.pad(w2, ((0, Dp - d_model), (0, Dp - d_model))).astype(compute_dtype)
    b1p = jnp.pad(b1, (0, Dp - d_model)).reshape(1, Dp).astype(jnp.float32)
    b2p = jnp.pad(b2, (0, Dp - d_model)).reshape(1, Dp).astype(jnp.float32)

    itm_w = compute_dtype.itemsize
    vmem_cap = _vmem_capacity_bytes()
    vmem_budget = int(0.8 * vmem_cap)

    def _resident_call(xp, nm, tm_eff, Mp, odt, vmem_limit, single_buffer_weights):
        if single_buffer_weights:
            def wspec(shape):
                # Constant index map -> a single VMEM buffer is enough.
                return pl.BlockSpec(shape, lambda i: (0, 0), pipeline_mode=pl.Buffered(1))
        else:
            def wspec(shape):
                return pl.BlockSpec(shape, lambda i: (0, 0))
        return pl.pallas_call(
            _fused_resident_kernel,
            out_shape=jax.ShapeDtypeStruct((Mp, Dp), odt),
            grid_spec=pltpu.PrefetchScalarGridSpec(
                num_scalar_prefetch=0,
                grid=(nm,),
                in_specs=[
                    pl.BlockSpec((tm_eff, K), lambda i: (i, 0)),   # x row tile
                    wspec((K, Dp)),                                # W1 resident
                    wspec((1, Dp)),                                # b1 resident
                    wspec((Dp, Dp)),                               # W2 resident
                    wspec((1, Dp)),                                # b2 resident
                ],
                out_specs=pl.BlockSpec((tm_eff, Dp), lambda i: (i, 0)),
            ),
            compiler_params=pltpu.CompilerParams(
                dimension_semantics=("parallel",),
                vmem_limit_bytes=vmem_limit,
            ),
        )(xp, w1p, b1p, w2p, b2p)

    def _tiled_call(xp, nm, tm_eff, Mp, odt):
        # Largest multiple of 128 that divides Dp and is <= tn (no Dp inflation).
        tn_cap = min(_round_up(tn, 128), Dp)
        tn_eff = 128
        for cand in range(128, tn_cap + 1, 128):
            if Dp % cand == 0:
                tn_eff = cand
        nn = Dp // tn_eff
        # Note: a K-tiled accumulator variant would be needed if the resident W1
        # block itself exceeded the VMEM budget (huge in_features); not required
        # at these sizes.
        return pl.pallas_call(
            _fused_tiled_kernel,
            out_shape=jax.ShapeDtypeStruct((Mp, Dp), odt),
            grid_spec=pltpu.PrefetchScalarGridSpec(
                num_scalar_prefetch=0,
                grid=(nm, nn),
                in_specs=[
                    pl.BlockSpec((tm_eff, K), lambda i, j: (i, 0)),   # x row tile
                    pl.BlockSpec((K, Dp), lambda i, j: (0, 0)),       # W1 resident
                    pl.BlockSpec((1, Dp), lambda i, j: (0, 0)),       # b1
                    pl.BlockSpec((Dp, tn_eff), lambda i, j: (0, j)),  # W2 col tile
                    pl.BlockSpec((1, tn_eff), lambda i, j: (0, j)),   # b2 col tile
                ],
                out_specs=pl.BlockSpec((tm_eff, tn_eff), lambda i, j: (i, j)),
                scratch_shapes=[pltpu.VMEM((tm_eff, Dp), compute_dtype)],
            ),
            compiler_params=pltpu.CompilerParams(
                dimension_semantics=("parallel", "arbitrary"),
                vmem_limit_bytes=int(0.9 * vmem_cap),
            ),
        )(xp, w1p, b1p, w2p, b2p)

    def forward(x):
        assert x.shape[-1] == in_features
        lead = x.shape[:-1]
        odt = jnp.dtype(out_dtype) if out_dtype is not None else jnp.dtype(x.dtype)
        x2d = x.reshape(-1, in_features)
        M = x2d.shape[0]

        # Row tile: sublane-aligned for the narrowest dtype touching HBM, and
        # capped so nm >= 2 when possible (keeps both v7x TensorCores busy).
        min_item = min(jnp.dtype(x.dtype).itemsize, odt.itemsize, itm_w)
        sub = {4: 8, 2: 16, 1: 32}.get(min_item, 8)
        tm_eff = min(_round_up(tm, sub), _round_up(M, sub))
        half = _round_up((M + 1) // 2, sub)
        if sub <= half < tm_eff:
            tm_eff = half
        Mp = _round_up(M, tm_eff)
        nm = Mp // tm_eff

        # Rows padded only when the grid requires it; x keeps its original dtype
        # (cast to compute_dtype happens in-kernel on the VPU).
        xp = x2d if Mp == M else jnp.pad(x2d, ((0, Mp - M), (0, 0)))

        x_item = jnp.dtype(x.dtype).itemsize
        weight_bytes = (K * Dp + Dp * Dp) * itm_w + 2 * Dp * 4
        act_bytes = 2 * tm_eff * (K * x_item + Dp * odt.itemsize) + 2 * tm_eff * Dp * 4
        resident_ok = 2 * weight_bytes + act_bytes <= vmem_budget

        if resident_ok:
            vmem_limit = int(min(0.9 * vmem_cap,
                                 max(32 * 1024 * 1024, 2 * weight_bytes + 2 * act_bytes)))
            try:
                out = _resident_call(xp, nm, tm_eff, Mp, odt, vmem_limit,
                                     single_buffer_weights=True)
                out = jax.block_until_ready(out)
            except Exception:
                # This jax build rejected single buffering for constant blocks;
                # fall back to default double buffering.
                out = _resident_call(xp, nm, tm_eff, Mp, odt, vmem_limit,
                                     single_buffer_weights=False)
        else:
            out = _tiled_call(xp, nm, tm_eff, Mp, odt)

        return out[:M, :d_model].reshape(*lead, d_model)

    return forward


def feature_extractor(x, w1, b1, w2, b2, **kwargs):
    """One-shot convenience wrapper (prefer make_feature_extractor to prepare
    the padded/cast weights once and reuse them across calls)."""
    return make_feature_extractor(w1, b1, w2, b2, **kwargs)(x)


def _init_linear(key, fan_in, fan_out, dtype=jnp.float32):
    # Mirrors nn.Linear init (uniform in [-1/sqrt(fan_in), 1/sqrt(fan_in)]),
    # stored transposed vs PyTorch as [in, out] so the kernel computes y = x @ W + b.
    kw, kb = jax.random.split(key)
    bound = 1.0 / jnp.sqrt(jnp.asarray(fan_in, dtype))
    w = jax.random.uniform(kw, (fan_in, fan_out), dtype, -bound, bound)
    b = jax.random.uniform(kb, (fan_out,), dtype, -bound, bound)
    return w, b


if __name__ == "__main__":
    key = jax.random.PRNGKey(0)
    k_x, k_l1, k_l2 = jax.random.split(key, 3)

    batch, seq, in_features, d_model = 2, 8, 16, 32

    x = jax.random.normal(k_x, (batch, seq, in_features), jnp.float32)
    w1, b1 = _init_linear(k_l1, in_features, d_model)   # LazyLinear(d_model)
    w2, b2 = _init_linear(k_l2, d_model, d_model)        # Linear(d_model, d_model)

    # Pure-JAX reference
    ref = jnp.maximum(x.reshape(-1, in_features) @ w1 + b1, 0.0) @ w2 + b2
    ref = ref.reshape(batch, seq, d_model)

    # Exact f32 path (weights prepared once, reused across calls)
    fx_f32 = make_feature_extractor(w1, b1, w2, b2)
    y = jax.block_until_ready(fx_f32(x))
    assert y.shape == (batch, seq, d_model)
    assert jnp.allclose(y, ref, atol=1e-5, rtol=1e-5)

    # bf16 MXU-operand path (full-rate MXU on v5e/v6e/v7x); accumulation, bias
    # add and ReLU stay float32.  Hidden activations are rounded to bf16 before
    # layer 2, hence the loose tolerance.
    fx_bf16 = make_feature_extractor(w1, b1, w2, b2, compute_dtype=jnp.bfloat16)
    y_bf16 = jax.block_until_ready(fx_bf16(x))
    assert jnp.allclose(y_bf16, ref, atol=1e-1, rtol=1e-1)

    print("KERNEL_OK")
</pallas_src>

<mosaic_0001>
module attributes {stable_mosaic.version = 11 : i64} {
  func.func @_fused_resident_kernel(%arg0: i32, %arg1: memref<8x16xf32, #tpu.memory_space<vmem>>, %arg2: memref<16x128xf32, #tpu.memory_space<vmem>>, %arg3: memref<1x128xf32, #tpu.memory_space<vmem>>, %arg4: memref<128x128xf32, #tpu.memory_space<vmem>>, %arg5: memref<1x128xf32, #tpu.memory_space<vmem>>, %arg6: memref<8x128xf32, #tpu.memory_space<vmem>>) attributes {dimension_semantics = [#tpu.dimension_semantics<parallel>], iteration_bounds = array<i64: 2>, scalar_prefetch = 0 : i64, scratch_operands = 0 : i64, tpu.core_type = #tpu.core_type<tc>, window_params = [{transform_indices = @transform_0, window_bounds = array<i64: 8, 16>}, {pipeline_mode = #tpu.pipeline_mode<synchronous>, transform_indices = @transform_1, window_bounds = array<i64: 16, 128>}, {pipeline_mode = #tpu.pipeline_mode<synchronous>, transform_indices = @transform_2, window_bounds = array<i64: 1, 128>}, {pipeline_mode = #tpu.pipeline_mode<synchronous>, transform_indices = @transform_3, window_bounds = array<i64: 128, 128>}, {pipeline_mode = #tpu.pipeline_mode<synchronous>, transform_indices = @transform_4, window_bounds = array<i64: 1, 128>}, {transform_indices = @transform_5, window_bounds = array<i64: 8, 128>}]} {
    %c0 = arith.constant 0 : index
    %c0_0 = arith.constant 0 : index
    %0 = vector.load %arg1[%c0, %c0_0] : memref<8x16xf32, #tpu.memory_space<vmem>>, vector<8x16xf32>
    %c0_1 = arith.constant 0 : index
    %c0_2 = arith.constant 0 : index
    %1 = vector.load %arg2[%c0_1, %c0_2] : memref<16x128xf32, #tpu.memory_space<vmem>>, vector<16x128xf32>
    %cst = arith.constant dense<0.000000e+00> : vector<8x128xf32>
    %2 = tpu.matmul %0, %1, %cst {dimension_numbers = #tpu.dot_dimension_numbers<[1], [0], [0], [1], [0, 0, 1, 1], [], []>} : vector<8x16xf32>, vector<16x128xf32>, vector<8x128xf32> -> vector<8x128xf32>
    %c0_3 = arith.constant 0 : index
    %c0_4 = arith.constant 0 : index
    %3 = vector.load %arg3[%c0_3, %c0_4] : memref<1x128xf32, #tpu.memory_space<vmem>>, vector<1x128xf32>
    %4 = vector.broadcast %3 : vector<1x128xf32> to vector<8x128xf32>
    %5 = arith.addf %2, %4 : vector<8x128xf32>
    %cst_5 = arith.constant 0.000000e+00 : f32
    %6 = vector.broadcast %cst_5 : f32 to vector<8x128xf32>
    %7 = arith.maximumf %5, %6 : vector<8x128xf32>
    %c0_6 = arith.constant 0 : index
    %c0_7 = arith.constant 0 : index
    %8 = vector.load %arg4[%c0_6, %c0_7] : memref<128x128xf32, #tpu.memory_space<vmem>>, vector<128x128xf32>
    %cst_8 = arith.constant dense<0.000000e+00> : vector<8x128xf32>
    %9 = tpu.matmul %7, %8, %cst_8 {dimension_numbers = #tpu.dot_dimension_numbers<[1], [0], [0], [1], [0, 0, 1, 1], [], []>} : vector<8x128xf32>, vector<128x128xf32>, vector<8x128xf32> -> vector<8x128xf32>
    %c0_9 = arith.constant 0 : index
    %c0_10 = arith.constant 0 : index
    %10 = vector.load %arg5[%c0_9, %c0_10] : memref<1x128xf32, #tpu.memory_space<vmem>>, vector<1x128xf32>
    %11 = vector.broadcast %10 : vector<1x128xf32> to vector<8x128xf32>
    %12 = arith.addf %9, %11 : vector<8x128xf32>
    %c0_11 = arith.constant 0 : index
    %c0_12 = arith.constant 0 : index
    %13 = vector.load %arg6[%c0_11, %c0_12] : memref<8x128xf32, #tpu.memory_space<vmem>>, vector<8x128xf32>
    tpu.vector_store %arg6[%c0_11, %c0_12], %12 {strides = array<i32>} : memref<8x128xf32, #tpu.memory_space<vmem>>, vector<8x128xf32>,
    return
  }
  func.func @transform_0(%arg0: i32) -> (i32, i32) {
    %c0_i32 = arith.constant 0 : i32
    %c0_i32_0 = arith.constant 0 : i32
    return %arg0, %c0_i32 : i32, i32
  }
  func.func @transform_1(%arg0: i32) -> (i32, i32) {
    %c0_i32 = arith.constant 0 : i32
    %c0_i32_0 = arith.constant 0 : i32
    %c0_i32_1 = arith.constant 0 : i32
    return %c0_i32, %c0_i32_0 : i32, i32
  }
  func.func @transform_2(%arg0: i32) -> (i32, i32) {
    %c0_i32 = arith.constant 0 : i32
    %c0_i32_0 = arith.constant 0 : i32
    %c0_i32_1 = arith.constant 0 : i32
    return %c0_i32, %c0_i32_0 : i32, i32
  }
  func.func @transform_3(%arg0: i32) -> (i32, i32) {
    %c0_i32 = arith.constant 0 : i32
    %c0_i32_0 = arith.constant 0 : i32
    %c0_i32_1 = arith.constant 0 : i32
    return %c0_i32, %c0_i32_0 : i32, i32
  }
  func.func @transform_4(%arg0: i32) -> (i32, i32) {
    %c0_i32 = arith.constant 0 : i32
    %c0_i32_0 = arith.constant 0 : i32
    %c0_i32_1 = arith.constant 0 : i32
    return %c0_i32, %c0_i32_0 : i32, i32
  }
  func.func @transform_5(%arg0: i32) -> (i32, i32) {
    %c0_i32 = arith.constant 0 : i32
    %c0_i32_0 = arith.constant 0 : i32
    return %arg0, %c0_i32 : i32, i32
  }
}

module attributes {stable_mosaic.version = 11 : i64} {
  func.func @_fused_resident_kernel(%arg0: i32, %arg1: memref<8x16xf32, #tpu.memory_space<vmem>>, %arg2: memref<16x128xf32, #tpu.memory_space<vmem>>, %arg3: memref<1x128xf32, #tpu.memory_space<vmem>>, %arg4: memref<128x128xf32, #tpu.memory_space<vmem>>, %arg5: memref<1x128xf32, #tpu.memory_space<vmem>>, %arg6: memref<8x128xf32, #tpu.memory_space<vmem>>) attributes {dimension_semantics = [#tpu.dimension_semantics<parallel>], iteration_bounds = array<i64: 2>, scalar_prefetch = 0 : i64, scratch_operands = 0 : i64, tpu.core_type = #tpu.core_type<tc>, window_params = [{transform_indices = @transform_0, window_bounds = array<i64: 8, 16>}, {pipeline_mode = #tpu.pipeline_mode<synchronous>, transform_indices = @transform_1, window_bounds = array<i64: 16, 128>}, {pipeline_mode = #tpu.pipeline_mode<synchronous>, transform_indices = @transform_2, window_bounds = array<i64: 1, 128>}, {pipeline_mode = #tpu.pipeline_mode<synchronous>, transform_indices = @transform_3, window_bounds = array<i64: 128, 128>}, {pipeline_mode = #tpu.pipeline_mode<synchronous>, transform_indices = @transform_4, window_bounds = array<i64: 1, 128>}, {transform_indices = @transform_5, window_bounds = array<i64: 8, 128>}]} {
    %c0 = arith.constant 0 : index
    %c0_0 = arith.constant 0 : index
    %0 = vector.load %arg1[%c0, %c0_0] : memref<8x16xf32, #tpu.memory_space<vmem>>, vector<8x16xf32>
    %c0_1 = arith.constant 0 : index
    %c0_2 = arith.constant 0 : index
    %1 = vector.load %arg2[%c0_1, %c0_2] : memref<16x128xf32, #tpu.memory_space<vmem>>, vector<16x128xf32>
    %cst = arith.constant dense<0.000000e+00> : vector<8x128xf32>
    %2 = tpu.matmul %0, %1, %cst {dimension_numbers = #tpu.dot_dimension_numbers<[1], [0], [0], [1], [0, 0, 1, 1], [], []>} : vector<8x16xf32>, vector<16x128xf32>, vector<8x128xf32> -> vector<8x128xf32>
    %c0_3 = arith.constant 0 : index
    %c0_4 = arith.constant 0 : index
    %3 = vector.load %arg3[%c0_3, %c0_4] : memref<1x128xf32, #tpu.memory_space<vmem>>, vector<1x128xf32>
    %4 = vector.broadcast %3 : vector<1x128xf32> to vector<8x128xf32>
    %5 = arith.addf %2, %4 : vector<8x128xf32>
    %cst_5 = arith.constant 0.000000e+00 : f32
    %6 = vector.broadcast %cst_5 : f32 to vector<8x128xf32>
    %7 = arith.maximumf %5, %6 : vector<8x128xf32>
    %c0_6 = arith.constant 0 : index
    %c0_7 = arith.constant 0 : index
    %8 = vector.load %arg4[%c0_6, %c0_7] : memref<128x128xf32, #tpu.memory_space<vmem>>, vector<128x128xf32>
    %cst_8 = arith.constant dense<0.000000e+00> : vector<8x128xf32>
    %9 = tpu.matmul %7, %8, %cst_8 {dimension_numbers = #tpu.dot_dimension_numbers<[1], [0], [0], [1], [0, 0, 1, 1], [], []>} : vector<8x128xf32>, vector<128x128xf32>, vector<8x128xf32> -> vector<8x128xf32>
    %c0_9 = arith.constant 0 : index
    %c0_10 = arith.constant 0 : index
    %10 = vector.load %arg5[%c0_9, %c0_10] : memref<1x128xf32, #tpu.memory_space<vmem>>, vector<1x128xf32>
    %11 = vector.broadcast %10 : vector<1x128xf32> to vector<8x128xf32>
    %12 = arith.addf %9, %11 : vector<8x128xf32>
    %c0_11 = arith.constant 0 : index
    %c0_12 = arith.constant 0 : index
    %13 = vector.load %arg6[%c0_11, %c0_12] : memref<8x128xf32, #tpu.memory_space<vmem>>, vector<8x128xf32>
    tpu.vector_store %arg6[%c0_11, %c0_12], %12 {strides = array<i32>} : memref<8x128xf32, #tpu.memory_space<vmem>>, vector<8x128xf32>,
    return
  }
  func.func @transform_0(%arg0: i32) -> (i32, i32) {
    %c0_i32 = arith.constant 0 : i32
    %c0_i32_0 = arith.constant 0 : i32
    return %arg0, %c0_i32 : i32, i32
  }
  func.func @transform_1(%arg0: i32) -> (i32, i32) {
    %c0_i32 = arith.constant 0 : i32
    %c0_i32_0 = arith.constant 0 : i32
    %c0_i32_1 = arith.constant 0 : i32
    return %c0_i32, %c0_i32_0 : i32, i32
  }
  func.func @transform_2(%arg0: i32) -> (i32, i32) {
    %c0_i32 = arith.constant 0 : i32
    %c0_i32_0 = arith.constant 0 : i32
    %c0_i32_1 = arith.constant 0 : i32
    return %c0_i32, %c0_i32_0 : i32, i32
  }
  func.func @transform_3(%arg0: i32) -> (i32, i32) {
    %c0_i32 = arith.constant 0 : i32
    %c0_i32_0 = arith.constant 0 : i32
    %c0_i32_1 = arith.constant 0 : i32
    return %c0_i32, %c0_i32_0 : i32, i32
  }
  func.func @transform_4(%arg0: i32) -> (i32, i32) {
    %c0_i32 = arith.constant 0 : i32
    %c0_i32_0 = arith.constant 0 : i32
    %c0_i32_1 = arith.constant 0 : i32
    return %c0_i32, %c0_i32_0 : i32, i32
  }
  func.func @transform_5(%arg0: i32) -> (i32, i32) {
    %c0_i32 = arith.constant 0 : i32
    %c0_i32_0 = arith.constant 0 : i32
    return %arg0, %c0_i32 : i32, i32
  }
}

</mosaic_0001>

<bundles_post_ra>
// kernel: tpu_custom_call.1
= control target key start
LH: loop header
LB: loop body
LE: loop exit
PB: predicated region body
PF: predicated region fallthrough
CT: control target
= control target key end

     0   :  { %10 = vsyncpa [#allocation3], 0  ;;  %s892_s0 = inlined_call_operand.hbm [shape: f32[16,16], index: 0, kind: input, shape index: {}]   ;;  %s893_s1 = inlined_call_operand.hbm [shape: f32[16,128], index: 1, kind: input, shape index: {}]   ;;  %s894_s2 = inlined_call_operand.vmem [shape: f32[1,128], index: 2, kind: input, shape index: {}]   ;;  %s895_s3 = inlined_call_operand.hbm [shape: f32[128,128], index: 3, kind: input, shape index: {}]   ;;  %s896_s4 = inlined_call_operand.vmem [shape: f32[1,128], index: 4, kind: input, shape index: {}]   ;;  %s897_s5 = inlined_call_operand.hbm [shape: f32[16,128], index: 5, kind: output, shape index: {}]  }
   0x1   :  { %12 = vsyncpa [#allocation3 + $0x1], 0 }
   0x2   :  { %13 = vsyncpa [#allocation6], 0 }
   0x3   :  { %14 = vsyncpa [#allocation4], 0 }
   0x4   :  { %16 = vsyncpa [#allocation4 + $0x1], 0  ;;  %s737_s18 = smov 0   ;;  %s739_s19 = smov 0  }
   0x5   :  { %s741_s20 = smov 0   ;;  %s743_s21 = smov 0  }
   0x6 LB: > { %s174_s24 = sshll.u32 %s893_s1, 4  ;;  %s761_s25 = sadd.s32 4294967295, %s701_s21   ;;  %s701_s21 = sphi %s743_s21, %s908_s21   ;;  %s697_s20 = sphi %s741_s20, %s907_s20   ;;  %s693_s19 = sphi %s739_s19, %s906_s19   ;;  %s689_s18 = sphi %s737_s18, %s905_s18   ;;  %s175_s24 = int_to_ptr.hbm [resolvable:$true] %s174_s24 }
   0x7   : > { %p454_p0 = scmp.ge.s32.totalorder %s701_s21, 1  ;;  %p43_p1 = scmp.eq.s32.totalorder %s761_s25, 0 }
   0x8   : > { %p163_p2 = scmp.lt.s32.totalorder %s701_s21, 3  ;;  %s703_s27 = smov [#allocation5]  }
   0x9   : > { %s176_s28 = sshll.u32 %s703_s27, 4  ;;  %s191_s6 = sshll.u32 %s895_s3, 4  ;;  %s177_s28 = int_to_ptr.vmem [resolvable:$true] %s176_s28  ;;  %s192_s6 = int_to_ptr.hbm [resolvable:$true] %s191_s6 }
   0xa   : > { %p766_p3 = pnand %p454_p0, %p163_p2  ;;  %s704_s7 = smov [#allocation7]  }
   0xb   : > { %s193_s8 = sshll.u32 %s704_s7, 4  ;;  %s705_s9 = smov 128   ;;  %s194_s8 = int_to_ptr.vmem [resolvable:$true] %s193_s8 }
   0xc   : > { %p482_p4 = pneg %p766_p3  ;;  %s706_s10 = smov 8  }
   0xd   : > { %s453_s11 = sadd.s32 4294967294, %s701_s21   ;;  %s780_s12 = sadd.s32 1, %s701_s21  }
   0xe   : > { %p483_p6 = pnand %p482_p4, %p43_p1  ;;  %s26_s13 = ssub.s32 %s701_s21, %s780_s12 }
   0xf   : > { %s29_s14 = sadd.s32 1, %s697_s20  ;;  %p27_p7 = scmp.eq.s32.totalorder %s26_s13, 0 }
  0x10   : > { %485 = dma.hbm_to_vmem [thread:$0]  (!%p483_p6), %s175_s24, 256, %s177_s28, [#allocation6], %s705_s9, %s705_s9, %s706_s10  }
  0x11   : > { %488 = dma.hbm_to_vmem [thread:$0]  (!%p483_p6), %s192_s6, 2048, %s194_s8, [#allocation6], %s705_s9, %s705_s9, %s706_s10  }
  0x12   : > { %p36_p8 = scmp.ne.s32.totalorder %s697_s20, %s693_s19  ;;  %p37_p9 = scmp.eq.s32.totalorder %s701_s21, 0 }
  0x13   : > { %p42_p10 = scmp.ne.s32.totalorder %s693_s19, %s689_s18  ;;  %p150_p13 = scmp.eq.s32.totalorder %s761_s25, 1 }
  0x14   : > { %s791_s15 = scalar_select %p27_p7, %s697_s20, %s29_s14  }
  0x15   : > { %p793_p11 = por %p37_p9, %p36_p8  ;;  %p799_p12 = por %p43_p1, %p42_p10 }
  0x16   : > { %p156_p0 = scmp.eq.s32.totalorder %s453_s11, 1  ;;  %p499_p2 = scmp.lt.s32.totalorder %s701_s21, 2 }
  0x17   : > { %s210_s22 = sand.u32 1, %s697_s20   ;;  %p806_p4 = por %p150_p13, %p36_p8 }
  0x18   : > { %p810_p6 = por %p156_p0, %p42_p10  ;;  %s458_s27 = sshll.u32 %s210_s22, 3 }
  0x19   : > { %s459_s28 = sshll.u32 %s701_s21, 3  ;;  %s214_s7 = scalar_lea.vmem [#allocation2], %s458_s27 }
  0x1a   : > { %s218_s6 = scalar_lea.hbm %s892_s0, %s459_s28  ;;  %s222_s8 = sshll.u32 %s214_s7, 4  ;;  %s223_s8 = int_to_ptr.vmem [resolvable:$true] %s222_s8 }
  0x1b   : > { %s220_s9 = sshll.u32 %s218_s6, 4  ;;  %p820_p7 = pnand %p499_p2, %p793_p11  ;;  %s221_s9 = int_to_ptr.hbm [resolvable:$true] %s220_s9 }
  0x1c   : > { %s211_s11 = scalar_lea.sflag [#allocation3], %s210_s22  ;;  %s601_s13 = sshra.s32 %s221_s9, 4  ;;  %s602_s13 = int_to_ptr.hbm [resolvable:$true] %s601_s13 }
  0x1d   : > { %s603_s14 = scalar_lea.hbm %s602_s13, 8  ;;  %p605_p9 = pneg %p820_p7 }
  0x1e   : > { %p604_p8 = scmp.ne.s32.totalorder %s602_s13, %s603_s14  ;;  %s608_s29 = scalar_lea.hbm %s892_s0, 16 }
  0x1f   : > { %p609_p11 = scmp.lt.s32.totalorder %s602_s13, %s892_s0  ;;  %p610_p0 = scmp.lt.s32.totalorder %s608_s29, %s603_s14 }
  0x20   : > { %p606_p10 = pnand %p605_p9, %p604_p8 }
  0x21   : > { %p611_p2 = por %p610_p0, %p609_p11 }
  0x22   : > { %p607_p13 = pneg %p606_p10 }
  0x24   : > { %p612_p5 = pnand %p611_p2, %p607_p13 }
  0x26   : > { %615 = shalt.err (!%p612_p5)
}
  0x27   : > { %492 = dma.hbm_to_vmem [thread:$0]  (!%p820_p7), %s221_s9, 128, %s223_s8, %s211_s11  }
  0x28   : > { %231 = sbr.rel (%p766_p3) target bundleno = 313 (0x139), region = 40  ;;  %s837_s22 = sand.u32 (!%p766_p3), 1, %s693_s19  }
  0x29   : > { %s461_s6 = sshll.u32 (!%p766_p3), %s837_s22, 3  ;;  %s234_s7 = scalar_lea.sflag (!%p766_p3), [#allocation3], %s837_s22 }
  0x2a   : > { %s237_s13 = scalar_lea.vmem (!%p766_p3), [#allocation2], %s461_s6 }
  0x2d   : > { %676 = dma.done.wait (%p799_p12), %s234_s7, 128  }
  0x2e   : > { %678 = vsyncadd (%p799_p12), %s234_s7, 4294967168 }
  0x2f   : > { %680 = dma.done.wait (%p43_p1), [#allocation6], 2304  }
  0x30   : > { %682 = vsyncadd (%p43_p1), [#allocation6], 4294964992  ;;  %v277_v0 = vld [vmem:[#allocation5 + $0x8] sm:$0xff]  ;;  %v276_v1 = vld [vmem:[#allocation5] sm:$0xff]  ;;  %vm282_vm0 = vcmask 130048   ;;  %s467_s8 = sshll.u32 %s761_s25, 3 }
  0x31   : > { %300 = vmatpush.msra.mxu0 %v277_v0  ;;  %v275_v2 = vld [vmem:[%s237_s13] sm:$0xff]  ;;  %v322_v3 = vld [vmem:[#allocation7 + $0x78] sm:$0xff]  ;;  %v321_v4 = vld [vmem:[#allocation7 + $0x70] sm:$0xff]  ;;  %s359_s11 = scalar_lea.hbm %s897_s5, %s467_s8  ;;  %s274_s28 = scalar_lea.vmem [#allocation8], %s461_s6 }
  0x32   : > { %327 = vmatpush.msra.mxu1 %v322_v3  ;;  %v320_v5 = vld [vmem:[#allocation7 + $0x68] sm:$0xff]  ;;  %v319_v6 = vld [vmem:[#allocation7 + $0x60] sm:$0xff]  ;;  %v318_v7 = vld [vmem:[#allocation7 + $0x58] sm:$0xff]  ;;  %s361_s29 = sshll.u32 %s274_s28, 4  ;;  %s363_s30 = sshll.u32 %s359_s11, 4  ;;  %s362_s29 = int_to_ptr.vmem [resolvable:$true] %s361_s29  ;;  %s364_s30 = int_to_ptr.hbm [resolvable:$true] %s363_s30 }
  0x33   : > { %301 = vmatpush.msra.mxu0 %v276_v1  ;;  %v317_v8 = vld [vmem:[#allocation7 + $0x50] sm:$0xff]  ;;  %v316_v9 = vld [vmem:[#allocation7 + $0x48] sm:$0xff]  ;;  %v315_v10 = vld [vmem:[#allocation7 + $0x40] sm:$0xff]  ;;  %s349_s16 = scalar_lea.sflag [#allocation4], %s837_s22  ;;  %s645_s25 = sshra.s32 %s364_s30, 4  ;;  %s646_s25 = int_to_ptr.hbm [resolvable:$true] %s645_s25 }
  0x34   : > { %465 = vmatmul.msk.f32.vlgmr.msra.gmra.mxu0 %vm282_vm0, %v275_v2  ;;  %328 = vmatpush.msra.mxu1 %v321_v4  ;;  %v314_v11 = vld [vmem:[#allocation7 + $0x38] sm:$0xff]  ;;  %v313_v12 = vld [vmem:[#allocation7 + $0x30] sm:$0xff]  ;;  %v312_v13 = vld [vmem:[#allocation7 + $0x28] sm:$0xff]  ;;  %s647_s7 = scalar_lea.hbm %s646_s25, 8  ;;  %s651_s17 = scalar_lea.hbm %s897_s5, 16 }
  0x35   : > { %v311_v14 = vld [vmem:[#allocation7 + $0x20] sm:$0xff]  ;;  %v310_v15 = vld [vmem:[#allocation7 + $0x18] sm:$0xff]  ;;  %v309_v16 = vld [vmem:[#allocation7 + $0x10] sm:$0xff]  ;;  %p648_p1 = scmp.ne.s32.totalorder %s646_s25, %s647_s7  ;;  %p652_p12 = scmp.lt.s32.totalorder %s646_s25, %s897_s5 }
  0x36   : > { %329 = vmatpush.msra.mxu1 %v320_v5  ;;  %v308_v17 = vld [vmem:[#allocation7 + $0x8] sm:$0xff]  ;;  %v307_v18 = vld [vmem:[#allocation7] sm:$0xff]  ;;  %p653_p7 = scmp.lt.s32.totalorder %s651_s17, %s647_s7 }
  0x37   : > { %v539_v19 = vld [vmem:[%s894_s2] ss:$0 sm:$0xff]  ;;  %p649_p3 = pnand %p648_p1, %p806_p4 }
  0x38   : > { %330 = vmatpush.msra.mxu1 %v319_v6  ;;  %v540_v23 = vld [vmem:[%s896_s4] ss:$0 sm:$0xff]  ;;  %p654_p8 = por %p653_p7, %p652_p12 }
  0x39   : > { %p650_p5 = pneg %p649_p3 }
  0x3a   : > { %331 = vmatpush.msra.mxu1 %v318_v7 }
  0x3b   : > { %p655_p9 = pnand %p654_p8, %p650_p5 }
  0x3c   : > { %332 = vmatpush.msra.mxu1 %v317_v8 }
  0x3e   : > { %333 = vmatpush.msra.mxu1 %v316_v9 }
  0x40   : > { %334 = vmatpush.msra.mxu1 %v315_v10 }
  0x42   : > { %335 = vmatpush.msra.mxu1 %v314_v11 }
  0x44   : > { %336 = vmatpush.msra.mxu1 %v313_v12 }
  0x46   : > { %337 = vmatpush.msra.mxu1 %v312_v13 }
  0x48   : > { %338 = vmatpush.msra.mxu1 %v311_v14 }
  0x4a   : > { %339 = vmatpush.msra.mxu1 %v310_v15 }
  0x4c   : > { %340 = vmatpush.msra.mxu1 %v309_v16 }
  0x4e   : > { %341 = vmatpush.msra.mxu1 %v308_v17 }
  0x50   : > { %342 = vmatpush.msra.mxu1 %v307_v18 }
  0xb1   : > { %v303_v20 = vpop.f32.mrf.mxu0 }
  0xb2   : > { %v304_v21 = vadd.f32 %v539_v19, %v303_v20 }
  0xb4   : > { %v306_v22 = vmax.f32 %v304_v21, 0.0 }
  0xb6   : > { %343 = vmatmul.f32.vlgmr.msra.gmra.mxu1 %v306_v22 }
 0x133   : > { %v344_v24 = vpop.f32.mrf.mxu1 }
 0x134   : > { %v345_v25 = vadd.f32 %v540_v23, %v344_v24 }
 0x136   : > { %347 = vst [vmem:[%s274_s28] sm:$0xff] %v345_v25 }
 0x137   : > { %658 = shalt.err (!%p655_p9)
}
 0x138   : > { %480 = dma.vmem_to_hbm [thread:$0]  (%p806_p4), %s362_s29, 128, %s364_s30, %s349_s16  }
 0x139 PF: > { %s375_s22 = sand.u32 1, %s689_s18   ;;  %p904_p10 = scmp.ge.s32.totalorder %s701_s21, 2 }
 0x13a   : > { %s376_s9 = scalar_lea.sflag [#allocation4], %s375_s22 }
 0x13b   : > { %p494_p13 = pnand %p904_p10, %p810_p6 }
 0x13d   : > { %p495_p11 = pneg %p494_p13 }
 0x13f   : > { %684 = dma.done.wait (%p495_p11), %s376_s9, 128  }
 0x140   : > { %686 = vsyncadd (%p495_p11), %s376_s9, 4294967168  ;;  %p19_p0 = scmp.ge.s32.totalorder %s780_s12, 4   ;;  %s905_s18 = smov %s693_s19 }
 0x141   : > { %s906_s19 = smov %s697_s20  ;;  %s907_s20 = smov %s791_s15 }
 0x142   : > { %s908_s21 = smov %s780_s12  ;;  %21 = sbr.rel (!%p19_p0) target bundleno = 6 (0x6), region = 93 }
 0x147   :  { %382 = vsyncpa [#allocation3], 1 }
 0x148   :  { %384 = vsyncpa [#allocation3 + $0x1], 1 }
 0x149   :  { %385 = vsyncpa [#allocation6], 1 }
 0x14a   :  { %386 = vsyncpa [#allocation4], 1 }
 0x14b   :  { %388 = vsyncpa [#allocation4 + $0x1], 1 }

// kernel: tpu_custom_call.1
= control target key start
LH: loop header
LB: loop body
LE: loop exit
PB: predicated region body
PF: predicated region fallthrough
CT: control target
= control target key end

     0   :  { %10 = vsyncpa [#allocation3], 0  ;;  %s892_s0 = inlined_call_operand.hbm [shape: f32[16,16], index: 0, kind: input, shape index: {}]   ;;  %s893_s1 = inlined_call_operand.hbm [shape: f32[16,128], index: 1, kind: input, shape index: {}]   ;;  %s894_s2 = inlined_call_operand.vmem [shape: f32[1,128], index: 2, kind: input, shape index: {}]   ;;  %s895_s3 = inlined_call_operand.hbm [shape: f32[128,128], index: 3, kind: input, shape index: {}]   ;;  %s896_s4 = inlined_call_operand.vmem [shape: f32[1,128], index: 4, kind: input, shape index: {}]   ;;  %s897_s5 = inlined_call_operand.hbm [shape: f32[16,128], index: 5, kind: output, shape index: {}]  }
   0x1   :  { %12 = vsyncpa [#allocation3 + $0x1], 0 }
   0x2   :  { %13 = vsyncpa [#allocation6], 0 }
   0x3   :  { %14 = vsyncpa [#allocation4], 0 }
   0x4   :  { %16 = vsyncpa [#allocation4 + $0x1], 0  ;;  %s737_s18 = smov 0   ;;  %s739_s19 = smov 0  }
   0x5   :  { %s741_s20 = smov 0   ;;  %s743_s21 = smov 0  }
   0x6 LB: > { %s174_s24 = sshll.u32 %s893_s1, 4  ;;  %s761_s25 = sadd.s32 4294967295, %s701_s21   ;;  %s701_s21 = sphi %s743_s21, %s908_s21   ;;  %s697_s20 = sphi %s741_s20, %s907_s20   ;;  %s693_s19 = sphi %s739_s19, %s906_s19   ;;  %s689_s18 = sphi %s737_s18, %s905_s18   ;;  %s175_s24 = int_to_ptr.hbm [resolvable:$true] %s174_s24 }
   0x7   : > { %p454_p0 = scmp.ge.s32.totalorder %s701_s21, 1  ;;  %p43_p1 = scmp.eq.s32.totalorder %s761_s25, 0 }
   0x8   : > { %p163_p2 = scmp.lt.s32.totalorder %s701_s21, 3  ;;  %s703_s27 = smov [#allocation5]  }
   0x9   : > { %s176_s28 = sshll.u32 %s703_s27, 4  ;;  %s191_s6 = sshll.u32 %s895_s3, 4  ;;  %s177_s28 = int_to_ptr.vmem [resolvable:$true] %s176_s28  ;;  %s192_s6 = int_to_ptr.hbm [resolvable:$true] %s191_s6 }
   0xa   : > { %p766_p3 = pnand %p454_p0, %p163_p2  ;;  %s704_s7 = smov [#allocation7]  }
   0xb   : > { %s193_s8 = sshll.u32 %s704_s7, 4  ;;  %s705_s9 = smov 128   ;;  %s194_s8 = int_to_ptr.vmem [resolvable:$true] %s193_s8 }
   0xc   : > { %p482_p4 = pneg %p766_p3  ;;  %s706_s10 = smov 8  }
   0xd   : > { %s453_s11 = sadd.s32 4294967294, %s701_s21   ;;  %s780_s12 = sadd.s32 1, %s701_s21  }
   0xe   : > { %p483_p6 = pnand %p482_p4, %p43_p1  ;;  %s26_s13 = ssub.s32 %s701_s21, %s780_s12 }
   0xf   : > { %s29_s14 = sadd.s32 1, %s697_s20  ;;  %p27_p7 = scmp.eq.s32.totalorder %s26_s13, 0 }
  0x10   : > { %485 = dma.hbm_to_vmem [thread:$0]  (!%p483_p6), %s175_s24, 256, %s177_s28, [#allocation6], %s705_s9, %s705_s9, %s706_s10  }
  0x11   : > { %488 = dma.hbm_to_vmem [thread:$0]  (!%p483_p6), %s192_s6, 2048, %s194_s8, [#allocation6], %s705_s9, %s705_s9, %s706_s10  }
  0x12   : > { %p36_p8 = scmp.ne.s32.totalorder %s697_s20, %s693_s19  ;;  %p37_p9 = scmp.eq.s32.totalorder %s701_s21, 0 }
  0x13   : > { %p42_p10 = scmp.ne.s32.totalorder %s693_s19, %s689_s18  ;;  %p150_p13 = scmp.eq.s32.totalorder %s761_s25, 1 }
  0x14   : > { %s791_s15 = scalar_select %p27_p7, %s697_s20, %s29_s14  }
  0x15   : > { %p793_p11 = por %p37_p9, %p36_p8  ;;  %p799_p12 = por %p43_p1, %p42_p10 }
  0x16   : > { %p156_p0 = scmp.eq.s32.totalorder %s453_s11, 1  ;;  %p499_p2 = scmp.lt.s32.totalorder %s701_s21, 2 }
  0x17   : > { %s210_s22 = sand.u32 1, %s697_s20   ;;  %p806_p4 = por %p150_p13, %p36_p8 }
  0x18   : > { %p810_p6 = por %p156_p0, %p42_p10  ;;  %s458_s27 = sshll.u32 %s210_s22, 3 }
  0x19   : > { %s459_s28 = sshll.u32 %s701_s21, 3  ;;  %s214_s7 = scalar_lea.vmem [#allocation2], %s458_s27 }
  0x1a   : > { %s218_s6 = scalar_lea.hbm %s892_s0, %s459_s28  ;;  %s222_s8 = sshll.u32 %s214_s7, 4  ;;  %s223_s8 = int_to_ptr.vmem [resolvable:$true] %s222_s8 }
  0x1b   : > { %s220_s9 = sshll.u32 %s218_s6, 4  ;;  %p820_p7 = pnand %p499_p2, %p793_p11  ;;  %s221_s9 = int_to_ptr.hbm [resolvable:$true] %s220_s9 }
  0x1c   : > { %s211_s11 = scalar_lea.sflag [#allocation3], %s210_s22  ;;  %s601_s13 = sshra.s32 %s221_s9, 4  ;;  %s602_s13 = int_to_ptr.hbm [resolvable:$true] %s601_s13 }
  0x1d   : > { %s603_s14 = scalar_lea.hbm %s602_s13, 8  ;;  %p605_p9 = pneg %p820_p7 }
  0x1e   : > { %p604_p8 = scmp.ne.s32.totalorder %s602_s13, %s603_s14  ;;  %s608_s29 = scalar_lea.hbm %s892_s0, 16 }
  0x1f   : > { %p609_p11 = scmp.lt.s32.totalorder %s602_s13, %s892_s0  ;;  %p610_p0 = scmp.lt.s32.totalorder %s608_s29, %s603_s14 }
  0x20   : > { %p606_p10 = pnand %p605_p9, %p604_p8 }
  0x21   : > { %p611_p2 = por %p610_p0, %p609_p11 }
  0x22   : > { %p607_p13 = pneg %p606_p10 }
  0x24   : > { %p612_p5 = pnand %p611_p2, %p607_p13 }
  0x26   : > { %615 = shalt.err (!%p612_p5)
}
  0x27   : > { %492 = dma.hbm_to_vmem [thread:$0]  (!%p820_p7), %s221_s9, 128, %s223_s8, %s211_s11  }
  0x28   : > { %231 = sbr.rel (%p766_p3) target bundleno = 313 (0x139), region = 40  ;;  %s837_s22 = sand.u32 (!%p766_p3), 1, %s693_s19  }
  0x29   : > { %s461_s6 = sshll.u32 (!%p766_p3), %s837_s22, 3  ;;  %s234_s7 = scalar_lea.sflag (!%p766_p3), [#allocation3], %s837_s22 }
  0x2a   : > { %s237_s13 = scalar_lea.vmem (!%p766_p3), [#allocation2], %s461_s6 }
  0x2d   : > { %676 = dma.done.wait (%p799_p12), %s234_s7, 128  }
  0x2e   : > { %678 = vsyncadd (%p799_p12), %s234_s7, 4294967168 }
  0x2f   : > { %680 = dma.done.wait (%p43_p1), [#allocation6], 2304  }
  0x30   : > { %682 = vsyncadd (%p43_p1), [#allocation6], 4294964992  ;;  %v277_v0 = vld [vmem:[#allocation5 + $0x8] sm:$0xff]  ;;  %v276_v1 = vld [vmem:[#allocation5] sm:$0xff]  ;;  %vm282_vm0 = vcmask 130048   ;;  %s467_s8 = sshll.u32 %s761_s25, 3 }
  0x31   : > { %300 = vmatpush.msra.mxu0 %v277_v0  ;;  %v275_v2 = vld [vmem:[%s237_s13] sm:$0xff]  ;;  %v322_v3 = vld [vmem:[#allocation7 + $0x78] sm:$0xff]  ;;  %v321_v4 = vld [vmem:[#allocation7 + $0x70] sm:$0xff]  ;;  %s359_s11 = scalar_lea.hbm %s897_s5, %s467_s8  ;;  %s274_s28 = scalar_lea.vmem [#allocation8], %s461_s6 }
  0x32   : > { %327 = vmatpush.msra.mxu1 %v322_v3  ;;  %v320_v5 = vld [vmem:[#allocation7 + $0x68] sm:$0xff]  ;;  %v319_v6 = vld [vmem:[#allocation7 + $0x60] sm:$0xff]  ;;  %v318_v7 = vld [vmem:[#allocation7 + $0x58] sm:$0xff]  ;;  %s361_s29 = sshll.u32 %s274_s28, 4  ;;  %s363_s30 = sshll.u32 %s359_s11, 4  ;;  %s362_s29 = int_to_ptr.vmem [resolvable:$true] %s361_s29  ;;  %s364_s30 = int_to_ptr.hbm [resolvable:$true] %s363_s30 }
  0x33   : > { %301 = vmatpush.msra.mxu0 %v276_v1  ;;  %v317_v8 = vld [vmem:[#allocation7 + $0x50] sm:$0xff]  ;;  %v316_v9 = vld [vmem:[#allocation7 + $0x48] sm:$0xff]  ;;  %v315_v10 = vld [vmem:[#allocation7 + $0x40] sm:$0xff]  ;;  %s349_s16 = scalar_lea.sflag [#allocation4], %s837_s22  ;;  %s645_s25 = sshra.s32 %s364_s30, 4  ;;  %s646_s25 = int_to_ptr.hbm [resolvable:$true] %s645_s25 }
  0x34   : > { %465 = vmatmul.msk.f32.vlgmr.msra.gmra.mxu0 %vm282_vm0, %v275_v2  ;;  %328 = vmatpush.msra.mxu1 %v321_v4  ;;  %v314_v11 = vld [vmem:[#allocation7 + $0x38] sm:$0xff]  ;;  %v313_v12 = vld [vmem:[#allocation7 + $0x30] sm:$0xff]  ;;  %v312_v13 = vld [vmem:[#allocation7 + $0x28] sm:$0xff]  ;;  %s647_s7 = scalar_lea.hbm %s646_s25, 8  ;;  %s651_s17 = scalar_lea.hbm %s897_s5, 16 }
  0x35   : > { %v311_v14 = vld [vmem:[#allocation7 + $0x20] sm:$0xff]  ;;  %v310_v15 = vld [vmem:[#allocation7 + $0x18] sm:$0xff]  ;;  %v309_v16 = vld [vmem:[#allocation7 + $0x10] sm:$0xff]  ;;  %p648_p1 = scmp.ne.s32.totalorder %s646_s25, %s647_s7  ;;  %p652_p12 = scmp.lt.s32.totalorder %s646_s25, %s897_s5 }
  0x36   : > { %329 = vmatpush.msra.mxu1 %v320_v5  ;;  %v308_v17 = vld [vmem:[#allocation7 + $0x8] sm:$0xff]  ;;  %v307_v18 = vld [vmem:[#allocation7] sm:$0xff]  ;;  %p653_p7 = scmp.lt.s32.totalorder %s651_s17, %s647_s7 }
  0x37   : > { %v539_v19 = vld [vmem:[%s894_s2] ss:$0 sm:$0xff]  ;;  %p649_p3 = pnand %p648_p1, %p806_p4 }
  0x38   : > { %330 = vmatpush.msra.mxu1 %v319_v6  ;;  %v540_v23 = vld [vmem:[%s896_s4] ss:$0 sm:$0xff]  ;;  %p654_p8 = por %p653_p7, %p652_p12 }
  0x39   : > { %p650_p5 = pneg %p649_p3 }
  0x3a   : > { %331 = vmatpush.msra.mxu1 %v318_v7 }
  0x3b   : > { %p655_p9 = pnand %p654_p8, %p650_p5 }
  0x3c   : > { %332 = vmatpush.msra.mxu1 %v317_v8 }
  0x3e   : > { %333 = vmatpush.msra.mxu1 %v316_v9 }
  0x40   : > { %334 = vmatpush.msra.mxu1 %v315_v10 }
  0x42   : > { %335 = vmatpush.msra.mxu1 %v314_v11 }
  0x44   : > { %336 = vmatpush.msra.mxu1 %v313_v12 }
  0x46   : > { %337 = vmatpush.msra.mxu1 %v312_v13 }
  0x48   : > { %338 = vmatpush.msra.mxu1 %v311_v14 }
  0x4a   : > { %339 = vmatpush.msra.mxu1 %v310_v15 }
  0x4c   : > { %340 = vmatpush.msra.mxu1 %v309_v16 }
  0x4e   : > { %341 = vmatpush.msra.mxu1 %v308_v17 }
  0x50   : > { %342 = vmatpush.msra.mxu1 %v307_v18 }
  0xb1   : > { %v303_v20 = vpop.f32.mrf.mxu0 }
  0xb2   : > { %v304_v21 = vadd.f32 %v539_v19, %v303_v20 }
  0xb4   : > { %v306_v22 = vmax.f32 %v304_v21, 0.0 }
  0xb6   : > { %343 = vmatmul.f32.vlgmr.msra.gmra.mxu1 %v306_v22 }
 0x133   : > { %v344_v24 = vpop.f32.mrf.mxu1 }
 0x134   : > { %v345_v25 = vadd.f32 %v540_v23, %v344_v24 }
 0x136   : > { %347 = vst [vmem:[%s274_s28] sm:$0xff] %v345_v25 }
 0x137   : > { %658 = shalt.err (!%p655_p9)
}
 0x138   : > { %480 = dma.vmem_to_hbm [thread:$0]  (%p806_p4), %s362_s29, 128, %s364_s30, %s349_s16  }
 0x139 PF: > { %s375_s22 = sand.u32 1, %s689_s18   ;;  %p904_p10 = scmp.ge.s32.totalorder %s701_s21, 2 }
 0x13a   : > { %s376_s9 = scalar_lea.sflag [#allocation4], %s375_s22 }
 0x13b   : > { %p494_p13 = pnand %p904_p10, %p810_p6 }
 0x13d   : > { %p495_p11 = pneg %p494_p13 }
 0x13f   : > { %684 = dma.done.wait (%p495_p11), %s376_s9, 128  }
 0x140   : > { %686 = vsyncadd (%p495_p11), %s376_s9, 4294967168  ;;  %p19_p0 = scmp.ge.s32.totalorder %s780_s12, 4   ;;  %s905_s18 = smov %s693_s19 }
 0x141   : > { %s906_s19 = smov %s697_s20  ;;  %s907_s20 = smov %s791_s15 }
 0x142   : > { %s908_s21 = smov %s780_s12  ;;  %21 = sbr.rel (!%p19_p0) target bundleno = 6 (0x6), region = 93 }
 0x147   :  { %382 = vsyncpa [#allocation3], 1 }
 0x148   :  { %384 = vsyncpa [#allocation3 + $0x1], 1 }
 0x149   :  { %385 = vsyncpa [#allocation6], 1 }
 0x14a   :  { %386 = vsyncpa [#allocation4], 1 }
 0x14b   :  { %388 = vsyncpa [#allocation4 + $0x1], 1 }

</bundles_post_ra>
